<compile_context>
chip_gen: v7x
topology: tpu7x:2x2x1
jax: 0.10.0
libtpu: 0.0.40
codegen_flags: <defaults>
</compile_context>

<pallas_src>
import numpy as np
import jax
import jax.numpy as jnp
from jax.experimental import pallas as pl
from jax.experimental.pallas import tpu as pltpu


# ---------------------------------------------------------------------------
# Kernel
# ---------------------------------------------------------------------------
# Weight slab (bf16, 320 x 384), all sections start on 16-row bf16 tile boundaries:
#   rows   0.. 31 : W1q (32, 96)   Linear(8,24)  kron-expanded over 4 batch sub-rows
#   rows  32..127 : W2q (96,192)   ConvT2d(4->2) as block-diag matmul, kron-4 expanded
#   rows 128..319 : W3q (192,384)  ConvT2d(2->1) as block-diag matmul, kron-4 expanded
# Bias slab (f32, 24 x 384), rows 8-aligned:
#   row 0: b1q (96,)   row 8: b2q (192,)   row 16: b3q (384,)
def conv_decoder_kernel(x_ref, w_ref, b_ref, o_ref):
    x = x_ref[...].astype(jnp.bfloat16)                       # (TB4, 32)

    w1 = w_ref[0:32, 0:96]                                    # (32, 96)   bf16
    w2 = w_ref[32:128, 0:192]                                 # (96, 192)  bf16
    w3 = w_ref[128:320, 0:384]                                # (192, 384) bf16
    b1 = b_ref[0:1, 0:96]                                     # (1, 96)    f32
    b2 = b_ref[8:9, 0:192]                                    # (1, 192)   f32
    b3 = b_ref[16:17, 0:384]                                  # (1, 384)   f32

    # Linear(8,24) + ReLU (4 batch rows packed per lane-row)
    h = jnp.dot(x, w1, preferred_element_type=jnp.float32) + b1
    h = jnp.maximum(h, 0.0).astype(jnp.bfloat16)              # (TB4, 96)

    # ConvTranspose2d(4->2, k=2, s=2) + ReLU, as block-diag matmul
    y1 = jnp.dot(h, w2, preferred_element_type=jnp.float32) + b2
    y1 = jnp.maximum(y1, 0.0).astype(jnp.bfloat16)            # (TB4, 192)

    # ConvTranspose2d(2->1, k=2, s=2), as block-diag matmul (no ReLU)
    y2 = jnp.dot(y1, w3, preferred_element_type=jnp.float32) + b3   # (TB4, 384) f32

    o_ref[...] = y2.astype(o_ref.dtype)                       # lane-dense, unmasked store


def conv_decoder_pallas(x, w_slab, b_slab, tb=512, out_dtype=jnp.bfloat16):
    """x: (B, 8) float. Returns (B, 1, 24, 4) in out_dtype.

    tb is the batch tile (sweep 512 / 1024 / 2048); must be a multiple of 32 when it is
    smaller than the (padded) batch.
    """
    B = x.shape[0]
    B4 = -(-B // 4)                      # ceil(B/4): rows of the 4-row-packed view
    Bp = B4 * 4
    if Bp != B:
        x = jnp.pad(x, ((0, Bp - B), (0, 0)))
    # (Bp, 8) row-major is the same flat memory as (B4, 32): pack 4 batch rows per row.
    x4 = x.reshape(B4, 32)

    tb4 = tb // 4
    if tb4 >= B4:
        tb4 = B4                         # single full-extent block (always legal)
    else:
        assert tb % 32 == 0, "tb must be a multiple of 32 when tiling the batch"

    out4 = pl.pallas_call(
        conv_decoder_kernel,
        out_shape=jax.ShapeDtypeStruct((B4, 384), out_dtype),
        grid=(pl.cdiv(B4, tb4),),
        in_specs=[
            pl.BlockSpec((tb4, 32), lambda i: (i, 0)),
            # Constant index_maps => both parameter slabs are DMA'd once and reused
            # for every grid step (no re-pipelining of constants).
            pl.BlockSpec(w_slab.shape, lambda i: (0, 0)),
            pl.BlockSpec(b_slab.shape, lambda i: (0, 0)),
        ],
        out_specs=pl.BlockSpec((tb4, 384), lambda i: (i, 0)),
        compiler_params=pltpu.CompilerParams(dimension_semantics=("parallel",)),
    )(x4, w_slab, b_slab)

    # (B4, 384) row-major == (Bp, 96) row-major; flat index per example is
    # H*4 + W of the (1, 24, 4) NCHW output, so this view is exactly the torch output.
    return out4.reshape(Bp, 96)[:B].reshape(B, 1, 24, 4)


# ---------------------------------------------------------------------------
# Parameter construction
# ---------------------------------------------------------------------------
def init_torch_params(key):
    """Deterministic synthetic parameters with the torch module's shapes."""
    k1, k2, k3, k4, k5, k6 = jax.random.split(key, 6)
    W1 = jax.random.uniform(k1, (24, 8), jnp.float32, -0.35, 0.35)       # Linear.weight
    b1 = jax.random.uniform(k2, (24,), jnp.float32, -0.35, 0.35)         # Linear.bias
    Wd1 = jax.random.uniform(k3, (4, 2, 2, 2), jnp.float32, -0.5, 0.5)   # ConvT2d(4,2).weight
    bd1 = jax.random.uniform(k4, (2,), jnp.float32, -0.5, 0.5)
    Wd2 = jax.random.uniform(k5, (2, 1, 2, 2), jnp.float32, -0.5, 0.5)   # ConvT2d(2,1).weight
    bd2 = jax.random.uniform(k6, (1,), jnp.float32, -0.5, 0.5)
    return W1, b1, Wd1, bd1, Wd2, bd2


def build_kernel_params(W1, b1, Wd1, bd1, Wd2, bd2):
    """Fold torch params into a bf16 weight slab + f32 bias slab for the kernel."""
    W1, b1, Wd1, bd1, Wd2, bd2 = (np.asarray(a, np.float32)
                                  for a in (W1, b1, Wd1, bd1, Wd2, bd2))

    # 1) Linear with column permutation: torch unflatten maps column n -> (c=n//6, i=n%6);
    #    we want columns ordered m = i*4 + c (spatial-major, channel minor).
    perm = np.array([(m % 4) * 6 + (m // 4) for m in range(24)])
    W1p = W1.T[:, perm]                                            # (8, 24)
    b1p = b1[perm]                                                 # (24,)

    # 2) ConvT2d(4,2,k=2,s=2): per input pixel out[co,dh,dw] = sum_ci in[ci]*Wd1[ci,co,dh,dw]
    Wd1m = np.transpose(Wd1, (0, 2, 3, 1)).reshape(4, 8)           # cols (dh, dw, co)
    W2m = np.kron(np.eye(6, dtype=np.float32), Wd1m)               # (24, 48), block per spatial i
    b2m = np.tile(np.tile(bd1, 4), 6)                              # (48,)

    # 3) ConvT2d(2,1,k=2,s=2): expand over the input width index w2 so the output column
    #    order is (dh2, w2, dw2) -> matches the NCHW flattening H*4 + W.
    eye2 = np.eye(2, dtype=np.float32)
    Wd2sq = Wd2[:, 0]                                              # (c, dh2, dw2)
    Wd2blk = (eye2[:, None, None, :, None] * Wd2sq[None, :, :, None, :]).reshape(4, 8)
    W3m = np.kron(np.eye(12, dtype=np.float32), Wd2blk)            # (48, 96), block per row j
    b3m = np.full((96,), bd2[0], np.float32)

    # 4) Lane-dense batch packing: fold 4 consecutive batch rows into one lane-row by
    #    kron-expanding every layer with eye(4).  The extra (zero-block) MXU work is
    #    negligible; the payoff is an unmasked 384-lane output store and no in-kernel
    #    relayout.
    eye4 = np.eye(4, dtype=np.float32)
    W1q, W2q, W3q = (np.kron(eye4, w) for w in (W1p, W2m, W3m))    # (32,96) (96,192) (192,384)
    b1q, b2q, b3q = (np.tile(b, 4) for b in (b1p, b2m, b3m))       # (96,) (192,) (384,)

    # Weight slab: bf16, all sections start on 16-row bf16 sublane-tile boundaries.
    w_slab = np.zeros((320, 384), np.float32)
    w_slab[0:32, 0:96] = W1q
    w_slab[32:128, 0:192] = W2q
    w_slab[128:320, 0:384] = W3q

    # Bias slab kept in f32 (tiny; avoids bf16-quantizing values added in f32).
    b_slab = np.zeros((24, 384), np.float32)
    b_slab[0, 0:96] = b1q
    b_slab[8, 0:192] = b2q
    b_slab[16, 0:384] = b3q

    return jnp.asarray(w_slab, jnp.bfloat16), jnp.asarray(b_slab, jnp.float32)


# ---------------------------------------------------------------------------
# Pure-JAX reference (exact torch forward, NCHW, f32)
# ---------------------------------------------------------------------------
def ref_forward(x, W1, b1, Wd1, bd1, Wd2, bd2):
    B = x.shape[0]
    h = jnp.maximum(x @ W1.T + b1, 0.0)                            # (B, 24)
    h = h.reshape(B, 4, 6, 1)                                      # Unflatten -> (B, 4, 6, 1)
    # ConvTranspose2d k=s=2: out[b,o,2i+d,2j+w] = sum_c in[b,c,i,j]*W[c,o,d,w] + bias[o]
    o1 = jnp.einsum('bcij,codw->boidjw', h, Wd1).reshape(B, 2, 12, 2)
    o1 = jnp.maximum(o1 + bd1[None, :, None, None], 0.0)
    o2 = jnp.einsum('bcij,codw->boidjw', o1, Wd2).reshape(B, 1, 24, 4)
    return o2 + bd2[None, :, None, None]


if __name__ == "__main__":
    key = jax.random.PRNGKey(0)
    kx, kp = jax.random.split(key)

    torch_params = init_torch_params(kp)
    w_slab, b_slab = build_kernel_params(*torch_params)

    # Main case: tb=512 -> grid of 8 steps (4 per TensorCore on v7x megacore),
    # enough steps for the BlockSpec pipeline to hide the input/output DMAs.
    B = 4096
    x = jax.random.normal(kx, (B, 8), jnp.float32)                 # torch input X: (B, 8)
    out = jax.block_until_ready(conv_decoder_pallas(x, w_slab, b_slab, tb=512))
    ref = ref_forward(x, *torch_params)
    # bf16 weights/activations/output with f32 accumulation -> loosened tolerances.
    np.testing.assert_allclose(np.asarray(out, np.float32), np.asarray(ref),
                               rtol=3e-2, atol=3e-2)

    # Ragged batch: B not a multiple of 4 or of tb -> wrapper pads, tail grid step is a
    # partial block whose padded output rows are discarded by Pallas.
    B2 = 999
    x2 = jax.random.normal(jax.random.PRNGKey(1), (B2, 8), jnp.float32)
    out2 = jax.block_until_ready(conv_decoder_pallas(x2, w_slab, b_slab, tb=512))
    ref2 = ref_forward(x2, *torch_params)
    np.testing.assert_allclose(np.asarray(out2, np.float32), np.asarray(ref2),
                               rtol=3e-2, atol=3e-2)

    print("KERNEL_OK")
</pallas_src>

<mosaic_0001>
module attributes {stable_mosaic.version = 11 : i64} {
  func.func @conv_decoder_kernel(%arg0: i32, %arg1: memref<128x32xf32, #tpu.memory_space<vmem>>, %arg2: memref<320x384xbf16, #tpu.memory_space<vmem>>, %arg3: memref<24x384xf32, #tpu.memory_space<vmem>>, %arg4: memref<128x384xbf16, #tpu.memory_space<vmem>>) attributes {dimension_semantics = [#tpu.dimension_semantics<parallel>], iteration_bounds = array<i64: 8>, scalar_prefetch = 0 : i64, scratch_operands = 0 : i64, tpu.core_type = #tpu.core_type<tc>, window_params = [{transform_indices = @transform_0, window_bounds = array<i64: 128, 32>}, {pipeline_mode = #tpu.pipeline_mode<synchronous>, transform_indices = @transform_1, window_bounds = array<i64: 320, 384>}, {pipeline_mode = #tpu.pipeline_mode<synchronous>, transform_indices = @transform_2, window_bounds = array<i64: 24, 384>}, {transform_indices = @transform_3, window_bounds = array<i64: 128, 384>}]} {
    %c0 = arith.constant 0 : index
    %c0_0 = arith.constant 0 : index
    %0 = vector.load %arg1[%c0, %c0_0] : memref<128x32xf32, #tpu.memory_space<vmem>>, vector<128x32xf32>
    %1 = arith.truncf %0 : vector<128x32xf32> to vector<128x32xbf16>
    %c0_1 = arith.constant 0 : index
    %c0_2 = arith.constant 0 : index
    %2 = vector.load %arg2[%c0_1, %c0_2] : memref<320x384xbf16, #tpu.memory_space<vmem>>, vector<32x96xbf16>
    %c32 = arith.constant 32 : index
    %c0_3 = arith.constant 0 : index
    %3 = vector.load %arg2[%c32, %c0_3] : memref<320x384xbf16, #tpu.memory_space<vmem>>, vector<96x192xbf16>
    %c128 = arith.constant 128 : index
    %c0_4 = arith.constant 0 : index
    %4 = vector.load %arg2[%c128, %c0_4] : memref<320x384xbf16, #tpu.memory_space<vmem>>, vector<192x384xbf16>
    %c0_5 = arith.constant 0 : index
    %c0_6 = arith.constant 0 : index
    %5 = vector.load %arg3[%c0_5, %c0_6] : memref<24x384xf32, #tpu.memory_space<vmem>>, vector<1x96xf32>
    %c8 = arith.constant 8 : index
    %c0_7 = arith.constant 0 : index
    %6 = vector.load %arg3[%c8, %c0_7] : memref<24x384xf32, #tpu.memory_space<vmem>>, vector<1x192xf32>
    %c16 = arith.constant 16 : index
    %c0_8 = arith.constant 0 : index
    %7 = vector.load %arg3[%c16, %c0_8] : memref<24x384xf32, #tpu.memory_space<vmem>>, vector<1x384xf32>
    %cst = arith.constant dense<0.000000e+00> : vector<128x96xf32>
    %8 = tpu.matmul %1, %2, %cst {dimension_numbers = #tpu.dot_dimension_numbers<[1], [0], [0], [1], [0, 0, 1, 1], [], []>} : vector<128x32xbf16>, vector<32x96xbf16>, vector<128x96xf32> -> vector<128x96xf32>
    %9 = vector.broadcast %5 : vector<1x96xf32> to vector<128x96xf32>
    %10 = arith.addf %8, %9 : vector<128x96xf32>
    %cst_9 = arith.constant 0.000000e+00 : f32
    %11 = vector.broadcast %cst_9 : f32 to vector<128x96xf32>
    %12 = arith.maximumf %10, %11 : vector<128x96xf32>
    %13 = arith.truncf %12 : vector<128x96xf32> to vector<128x96xbf16>
    %cst_10 = arith.constant dense<0.000000e+00> : vector<128x192xf32>
    %14 = tpu.matmul %13, %3, %cst_10 {dimension_numbers = #tpu.dot_dimension_numbers<[1], [0], [0], [1], [0, 0, 1, 1], [], []>} : vector<128x96xbf16>, vector<96x192xbf16>, vector<128x192xf32> -> vector<128x192xf32>
    %15 = vector.broadcast %6 : vector<1x192xf32> to vector<128x192xf32>
    %16 = arith.addf %14, %15 : vector<128x192xf32>
    %cst_11 = arith.constant 0.000000e+00 : f32
    %17 = vector.broadcast %cst_11 : f32 to vector<128x192xf32>
    %18 = arith.maximumf %16, %17 : vector<128x192xf32>
    %19 = arith.truncf %18 : vector<128x192xf32> to vector<128x192xbf16>
    %cst_12 = arith.constant dense<0.000000e+00> : vector<128x384xf32>
    %20 = tpu.matmul %19, %4, %cst_12 {dimension_numbers = #tpu.dot_dimension_numbers<[1], [0], [0], [1], [0, 0, 1, 1], [], []>} : vector<128x192xbf16>, vector<192x384xbf16>, vector<128x384xf32> -> vector<128x384xf32>
    %21 = vector.broadcast %7 : vector<1x384xf32> to vector<128x384xf32>
    %22 = arith.addf %20, %21 : vector<128x384xf32>
    %23 = arith.truncf %22 : vector<128x384xf32> to vector<128x384xbf16>
    %c0_13 = arith.constant 0 : index
    %c0_14 = arith.constant 0 : index
    %24 = vector.load %arg4[%c0_13, %c0_14] : memref<128x384xbf16, #tpu.memory_space<vmem>>, vector<128x384xbf16>
    tpu.vector_store %arg4[%c0_13, %c0_14], %23 {strides = array<i32>} : memref<128x384xbf16, #tpu.memory_space<vmem>>, vector<128x384xbf16>,
    return
  }
  func.func @transform_0(%arg0: i32) -> (i32, i32) {
    %c0_i32 = arith.constant 0 : i32
    %c0_i32_0 = arith.constant 0 : i32
    return %arg0, %c0_i32 : i32, i32
  }
  func.func @transform_1(%arg0: i32) -> (i32, i32) {
    %c0_i32 = arith.constant 0 : i32
    %c0_i32_0 = arith.constant 0 : i32
    %c0_i32_1 = arith.constant 0 : i32
    return %c0_i32, %c0_i32_0 : i32, i32
  }
  func.func @transform_2(%arg0: i32) -> (i32, i32) {
    %c0_i32 = arith.constant 0 : i32
    %c0_i32_0 = arith.constant 0 : i32
    %c0_i32_1 = arith.constant 0 : i32
    return %c0_i32, %c0_i32_0 : i32, i32
  }
  func.func @transform_3(%arg0: i32) -> (i32, i32) {
    %c0_i32 = arith.constant 0 : i32
    %c0_i32_0 = arith.constant 0 : i32
    return %arg0, %c0_i32 : i32, i32
  }
}

</mosaic_0001>

<bundles_post_ra>
// kernel: tpu_custom_call.1
= control target key start
LH: loop header
LB: loop body
LE: loop exit
PB: predicated region body
PF: predicated region fallthrough
CT: control target
= control target key end

     0   :  { %8 = vsyncpa [#allocation3], 0  ;;  %s2373_s0 = inlined_call_operand.vmem [shape: f32[1024,32], index: 0, kind: input, shape index: {}]   ;;  %s2374_s1 = inlined_call_operand.vmem [shape: bf16[320,384], index: 1, kind: input, shape index: {}]   ;;  %s2375_s2 = inlined_call_operand.vmem [shape: f32[24,384], index: 2, kind: input, shape index: {}]   ;;  %s2376_s3 = inlined_call_operand.hbm [shape: bf16[1024,384], index: 3, kind: output, shape index: {}]  }
   0x1   :  { %10 = vsyncpa [#allocation3 + $0x1], 0  ;;  %s1806_s12 = smov 0   ;;  %s1808_s13 = smov 0  }
   0x2   :  { %s1810_s14 = smov 0   ;;  %s1812_s15 = smov 0  }
   0x3 LB: > { %s1827_s16 = sadd.s32 4294967295, %s1780_s15   ;;  %s1393_s17 = sadd.s32 4294967294, %s1780_s15   ;;  %s1780_s15 = sphi %s1812_s15, %s2382_s15   ;;  %s1776_s14 = sphi %s1810_s14, %s2381_s14   ;;  %s1772_s13 = sphi %s1808_s13, %s2380_s13   ;;  %s1768_s12 = sphi %s1806_s12, %s2379_s12  }
   0x4   : > { %s1831_s18 = sadd.s32 1, %s1780_s15   ;;  %s91_s19 = sadd.s32 1, %s1776_s14 }
   0x5   : > { %s88_s20 = ssub.s32 %s1780_s15, %s1831_s18  ;;  %p101_p0 = scmp.ne.s32.totalorder %s1776_s14, %s1772_s13 }
   0x6   : > { %p89_p1 = scmp.eq.s32.totalorder %s88_s20, 0  ;;  %p102_p2 = scmp.eq.s32.totalorder %s1827_s16, 7 }
   0x7   : > { %p107_p3 = scmp.ne.s32.totalorder %s1772_s13, %s1768_s12  ;;  %p108_p4 = scmp.eq.s32.totalorder %s1393_s17, 7 }
   0x8   : > { %s1842_s21 = scalar_select %p89_p1, %s1776_s14, %s91_s19  }
   0x9   : > { %p1844_p5 = por %p102_p2, %p101_p0  ;;  %p1848_p6 = por %p108_p4, %p107_p3 }
   0xa   : > { %p1396_p7 = scmp.ge.s32.totalorder %s1780_s15, 1  ;;  %p141_p8 = scmp.lt.s32.totalorder %s1780_s15, 9 }
   0xc   : > { %p142_p9 = pnand %p1396_p7, %p141_p8 }
   0xd   : > { %v1650_v0 = vld [vmem:[%s2374_s1] ss:$12 sps:$4 sm:$0xff] (!%p142_p9)   ;;  %v1651_v1 = vld [vmem:[%s2374_s1 + $0x18] ss:$12 sps:$4 sm:$0xff] (!%p142_p9)   ;;  %s1397_s28 = sshll.u32 (!%p142_p9), %s1827_s16, 4  ;;  %vm278_vm0 = vcmask (!%p142_p9), 261120  }
   0xe   : > { %145 = sbr.rel (%p142_p9) target bundleno = 776 (0x308), region = 32  ;;  %1562 = vmatprep.subr.bf16.mxu0 (!%p142_p9), %v1650_v0  ;;  %v1652_v2 = vld [vmem:[%s2374_s1 + $0x34] ss:$12 sps:$4 sm:$0xff] (!%p142_p9)   ;;  %p166_p10 = scmp.lt.s32.totalorder (!%p142_p9), %s1397_s28, 127  ;;  %v1654_v3 = vld [vmem:[%s2374_s1 + $0x30] ss:$12 sps:$4 sm:$0xff] (!%p142_p9)  }
   0xf   : > { %1563 = vmatpush3.bf16.msra.mxu0 (!%p142_p9), %v1650_v0  ;;  %520 = vmatprep.subr.bf16.mxu1 (!%p142_p9), %v1652_v2  ;;  %v1655_v4 = vld [vmem:[%s2374_s1 + $0x4c] ss:$12 sps:$4 sm:$0xff] (!%p142_p9)   ;;  %v1657_v5 = vld [vmem:[%s2374_s1 + $0x48] ss:$12 sps:$4 sm:$0xff] (!%p142_p9)   ;;  %v1658_v6 = vld [vmem:[%s2374_s1 + $0x64] ss:$12 sps:$4 sm:$0xff] (!%p142_p9)  }
  0x10   : > { %1564 = vmatprep.subr.bf16.mxu0 (!%p142_p9), %v1651_v1  ;;  %521 = vmatpush1.bf16.msra.mxu1 (!%p142_p9), %v1654_v3  ;;  %v1660_v7 = vld [vmem:[%s2374_s1 + $0x60] ss:$12 sps:$4 sm:$0xff] (!%p142_p9)   ;;  %v1661_v8 = vld [vmem:[%s2374_s1 + $0x7c] ss:$12 sps:$4 sm:$0xff] (!%p142_p9)   ;;  %v1663_v18 = vld [vmem:[%s2374_s1 + $0x78] ss:$12 sps:$4 sm:$0xff] (!%p142_p9)  }
  0x11   : > { %522 = vmatprep.subr.bf16.mxu1 (!%p142_p9), %v1655_v4  ;;  %v1664_v34 = vld [vmem:[%s2374_s1 + $0x94] ss:$12 sps:$4 sm:$0xff] (!%p142_p9)   ;;  %v1666_v35 = vld [vmem:[%s2374_s1 + $0x90] ss:$12 sps:$4 sm:$0xff] (!%p142_p9)   ;;  %v1667_v36 = vld [vmem:[%s2374_s1 + $0xac] ss:$12 sps:$4 sm:$0xff] (!%p142_p9)  }
  0x12   : > { %v1669_v37 = vld [vmem:[%s2374_s1 + $0xa8] ss:$12 sps:$4 sm:$0xff] (!%p142_p9)   ;;  %v1782_v38 = vmov (!%p142_p9), 0   ;;  %v1670_v39 = vld [vmem:[%s2374_s1 + $0xc0] ss:$12 sps:$4 sm:$0xff] (!%p142_p9)   ;;  %vm495_vm1 = vcmask (!%p142_p9), 785408  }
  0x13   : > { %1565 = vmatpush3.bf16.msra.mxu0 (!%p142_p9), %v1651_v1  ;;  %552 = vmatprep.mubr.bf16.mxu1 (!%p142_p9), %v1782_v38  ;;  %v1672_v40 = vld [vmem:[%s2374_s1 + $0xc4] ss:$12 sps:$4 sm:$0xff] (!%p142_p9)   ;;  %v1675_v41 = vld [vmem:[%s2374_s1 + $0xdc] ss:$12 sps:$4 sm:$0xff] (!%p142_p9)   ;;  %v1678_v43 = vld [vmem:[%s2374_s1 + $0xf4] ss:$12 sps:$4 sm:$0xff] (!%p142_p9)  }
  0x14   : > { %523 = vmatpush1.bf16.msra.mxu1 (!%p142_p9), %v1657_v5  ;;  %914 = vmatprep.subr.bf16.mxu0 (!%p142_p9), %v1672_v40  ;;  %v1673_v42 = vld [vmem:[%s2374_s1 + $0xd8] ss:$12 sps:$4 sm:$0xff] (!%p142_p9)   ;;  %v1676_v44 = vld [vmem:[%s2374_s1 + $0xf0] ss:$12 sps:$4 sm:$0xff] (!%p142_p9)   ;;  %v1679_v46 = vld [vmem:[%s2374_s1 + $0x108] ss:$12 sps:$4 sm:$0xff] (!%p142_p9)  }
  0x15   : > { %s2384_s28 = smov (!%p166_p10, %s1397_s28), 127  ;;  %524 = vmatprep.subr.bf16.mxu1 %v1658_v6  ;;  %v1681_v45 = vld [vmem:[%s2374_s1 + $0x10c] ss:$12 sps:$4 sm:$0xff]   ;;  %v1684_v47 = vld [vmem:[%s2374_s1 + $0x124] ss:$12 sps:$4 sm:$0xff]   ;;  %vm889_vm2 = vcmask 523264  }
  0x16   : > { %s1398_s17 = sshll.u32 %s2384_s28, 3  ;;  %v1682_v48 = vld [vmem:[%s2374_s1 + $0x120] ss:$12 sps:$4 sm:$0xff]   ;;  %v1688_v49 = vld [vmem:[%s2374_s1 + $0x13c] ss:$12 sps:$4 sm:$0xff]   ;;  %s162_s27 = sand.u32 1, %s1772_s13  }
  0x17   : > { %s1882_s26 = scalar_lea.vmem %s2373_s0, %s1398_s17  ;;  %v1686_v50 = vld [vmem:[%s2374_s1 + $0x138] ss:$12 sps:$4 sm:$0xff]   ;;  %v1692_v51 = vld [vmem:[%s2374_s1 + $0x154] ss:$12 sps:$4 sm:$0xff]   ;;  %v1690_v52 = vld [vmem:[%s2374_s1 + $0x150] ss:$12 sps:$4 sm:$0xff]  }
  0x18   : > { %v173_v9 = vld [vmem:[%s1882_s26] sm:$0xff]  ;;  %v174_v10 = vld [vmem:[%s1882_s26 + $0x8] sm:$0xff]  ;;  %v175_v11 = vld [vmem:[%s1882_s26 + $0x10] sm:$0xff]  ;;  %525 = vmatpush1.bf16.msra.mxu1 %v1660_v7  ;;  %s1606_s29 = smul.u32 192, %s162_s27  ;;  %s1783_s9 = smov [#allocation2]  }
  0x19   : > { %v189_v12 = vpack.c.bf16 %v174_v10, %v173_v9  ;;  %v176_v13 = vld [vmem:[%s1882_s26 + $0x18] sm:$0xff]  ;;  %v177_v14 = vld [vmem:[%s1882_s26 + $0x20] sm:$0xff]  ;;  %v178_v15 = vld [vmem:[%s1882_s26 + $0x28] sm:$0xff]  ;;  %526 = vmatprep.subr.bf16.mxu1 %v1661_v8  ;;  %s1607_s30 = smul.u32 3072, %s1827_s16  ;;  %s2332_s16 = scalar_lea.sflag [#allocation3], %s162_s27 }
  0x1a   : > { %v190_v16 = vpack.c.bf16 %v176_v13, %v175_v11  ;;  %v191_v17 = vpack.c.bf16 %v178_v15, %v177_v14  ;;  %v179_v19 = vld [vmem:[%s1882_s26 + $0x30] sm:$0xff]  ;;  %v180_v20 = vld [vmem:[%s1882_s26 + $0x38] sm:$0xff]  ;;  %v181_v21 = vld [vmem:[%s1882_s26 + $0x40] sm:$0xff]  ;;  %s2240_s28 = scalar_lea.vmem [#allocation2], %s1606_s29  ;;  %s1722_s10 = sshll.u32 %s1783_s9, 4  ;;  %s1723_s10 = int_to_ptr.vmem [resolvable:$false] %s1722_s10 }
  0x1b   : > { %1566 = vmatprep.mubr.msk.bf16.mxu0 %vm278_vm0, %v189_v12  ;;  %v182_v22 = vld [vmem:[%s1882_s26 + $0x48] sm:$0xff]  ;;  %v192_v23 = vpack.c.bf16 %v180_v20, %v179_v19  ;;  %v183_v25 = vld [vmem:[%s1882_s26 + $0x50] sm:$0xff]  ;;  %v184_v26 = vld [vmem:[%s1882_s26 + $0x58] sm:$0xff]  ;;  %s1331_s4 = sshll.u32 %s2240_s28, 4  ;;  %s2324_s7 = scalar_lea.hbm %s2376_s3, %s1607_s30  ;;  %s2326_s4 = int_to_ptr.vmem [resolvable:$true] %s1331_s4 }
  0x1c   : > { %1567 = vmatmul.mubr.msk.bf16.vlgmr.msra.gmra.mrb[0].mxu0 %vm278_vm0, %v190_v16  ;;  %527 = vmatpush1.bf16.msra.mxu1 %v1663_v18  ;;  %v193_v24 = vpack.c.bf16 %v182_v22, %v181_v21  ;;  %v185_v27 = vld [vmem:[%s1882_s26 + $0x60] sm:$0xff]  ;;  %v186_v28 = vld [vmem:[%s1882_s26 + $0x68] sm:$0xff]  ;;  %v194_v29 = vpack.c.bf16 %v184_v26, %v183_v25  ;;  %v187_v31 = vld [vmem:[%s1882_s26 + $0x70] sm:$0xff]  ;;  %s1718_s8 = scalar_lea.vmem %s2326_s4, 3072  ;;  %s1724_s11 = scalar_lea.vmem %s1723_s10, 6144 }
  0x1d   : > { %1570 = vmatprep.mubr.msk.bf16.mxu0 %vm278_vm0, %v191_v17  ;;  %v195_v30 = vpack.c.bf16 %v186_v28, %v185_v27  ;;  %v188_v32 = vld [vmem:[%s1882_s26 + $0x78] sm:$0xff]  ;;  %528 = vmatprep.subr.bf16.mxu1 %v1664_v34  ;;  %v1694_v54 = vld [vmem:[%s2374_s1 + $0x168] ss:$12 sps:$4 sm:$0xff]   ;;  %v1700_v55 = vld [vmem:[%s2374_s1 + $0x184] ss:$12 sps:$4 sm:$0xff]   ;;  %p1719_p11 = scmp.ne.s32.totalorder %s2326_s4, %s1718_s8  ;;  %p1725_p0 = scmp.lt.s32.totalorder %s2326_s4, %s1723_s10 }
  0x1e   : > { %v196_v33 = vpack.c.bf16 %v188_v32, %v187_v31  ;;  %915 = vmatpush1.bf16.msra.mxu0 %v1670_v39  ;;  %v1696_v53 = vld [vmem:[%s2374_s1 + $0x16c] ss:$12 sps:$4 sm:$0xff]   ;;  %v1704_v57 = vld [vmem:[%s2374_s1 + $0x19c] ss:$12 sps:$4 sm:$0xff]   ;;  %v1991_v59 = vld [vmem:[%s2375_s2] ss:$0 sm:$0xff]  ;;  %p1726_p1 = scmp.lt.s32.totalorder %s1724_s11, %s1718_s8 }
  0x1f   : > { %916 = vmatprep.subr.bf16.mxu0 %v1675_v41  ;;  %v1698_v56 = vld [vmem:[%s2374_s1 + $0x180] ss:$12 sps:$4 sm:$0xff]   ;;  %v1702_v58 = vld [vmem:[%s2374_s1 + $0x198] ss:$12 sps:$4 sm:$0xff]   ;;  %v2000_v9 = vld [vmem:[%s2374_s1 + $0xc8] ss:$12 sps:$4 sm:$0xff]   ;;  %p1720_p12 = pnand %p1719_p11, %p1844_p5 }
  0x20   : > { %529 = vmatpush1.bf16.msra.mxu1 %v1666_v35  ;;  %v2011_v19 = vld [vmem:[%s2374_s1 + $0xe0] ss:$12 sps:$4 sm:$0xff]   ;;  %v2019_v25 = vld [vmem:[%s2374_s1 + $0xf8] ss:$12 sps:$4 sm:$0xff]   ;;  %v2031_v35 = vld [vmem:[%s2374_s1 + $0x110] ss:$12 sps:$4 sm:$0xff]   ;;  %p1727_p2 = por %p1726_p1, %p1725_p0 }
  0x21   : > { %530 = vmatprep.subr.bf16.mxu1 %v1667_v36  ;;  %p1721_p13 = pneg %p1720_p12 }
  0x22   : > { %917 = vmatpush1.bf16.msra.mxu0 %v1673_v42  ;;  %v2039_v42 = vld [vmem:[%s2374_s1 + $0x128] ss:$12 sps:$4 sm:$0xff]  }
  0x23   : > { %918 = vmatprep.subr.bf16.mxu0 %v1678_v43  ;;  %p1728_p3 = pnand %p1727_p2, %p1721_p13 }
  0x24   : > { %1571 = vmatmul.mubr.msk.bf16.gmra.mrb[4].mxu0 %vm278_vm0, %v192_v23  ;;  %531 = vmatpush1.bf16.msra.mxu1 %v1669_v37 }
  0x25   : > { %1574 = vmatprep.mubr.msk.bf16.mxu0 %vm278_vm0, %v193_v24  ;;  %1582 = vmatprep.subr.bf16.mxu1 %v1782_v38 }
  0x26   : > { %919 = vmatpush1.bf16.msra.mxu0 %v1676_v44 }
  0x27   : > { %920 = vmatprep.subr.bf16.mxu0 %v1681_v45 }
  0x2a   : > { %921 = vmatpush1.bf16.msra.mxu0 %v1679_v46 }
  0x2b   : > { %922 = vmatprep.subr.bf16.mxu0 %v1684_v47 }
  0x2c   : > { %1575 = vmatmul.mubr.msk.bf16.gmra.mrb[8].mxu0 %vm278_vm0, %v194_v29 }
  0x2d   : > { %1578 = vmatprep.mubr.msk.bf16.mxu0 %vm278_vm0, %v195_v30 }
  0x2e   : > { %923 = vmatpush1.bf16.msra.mxu0 %v1682_v48 }
  0x2f   : > { %924 = vmatprep.subr.bf16.mxu0 %v1688_v49 }
  0x32   : > { %925 = vmatpush1.bf16.msra.mxu0 %v1686_v50 }
  0x33   : > { %926 = vmatprep.subr.bf16.mxu0 %v1692_v51 }
  0x34   : > { %1579 = vmatmul.mubr.msk.bf16.gmra.mrb[12].mxu0 %vm278_vm0, %v196_v33 }
  0x36   : > { %927 = vmatpush1.bf16.msra.mxu0 %v1690_v52 }
  0x37   : > { %928 = vmatprep.subr.bf16.mxu0 %v1696_v53 }
  0x3a   : > { %929 = vmatpush1.bf16.msra.mxu0 %v1694_v54 }
  0x3b   : > { %930 = vmatprep.subr.bf16.mxu0 %v1700_v55 }
  0x3e   : > { %931 = vmatpush1.bf16.msra.mxu0 %v1698_v56 }
  0x3f   : > { %932 = vmatprep.subr.bf16.mxu0 %v1704_v57 }
  0x42   : > { %933 = vmatpush1.bf16.msra.mxu0 %v1702_v58  ;;  %v2062_v58 = vld [vmem:[%s2374_s1 + $0x140] ss:$12 sps:$4 sm:$0xff]  }
  0xef   : > { %v1568_v60 = vpop.f32.mrb[0].mxu0 }
  0xf0   : > { %v346_v61 = vadd.f32 %v1568_v60, %v1991_v59  ;;  %v337_v62 = vpop.f32.mrb[1].mxu0  ;;  %v1706_v60 = vld [vmem:[%s2374_s1 + $0x1b0] ss:$12 sps:$4 sm:$0xff]  }
  0xf1   : > { %v338_v63 = vadd.f32 %v337_v62, %v1991_v59  ;;  %v1569_v0 = vpop.f32.mrb[2].mxu0  ;;  %v1712_v62 = vld [vmem:[%s2374_s1 + $0x1cc] ss:$12 sps:$4 sm:$0xff]  }
  0xf2   : > { %v349_v1 = vadd.f32 %v1569_v0, %v1991_v59  ;;  %v340_v2 = vpop.f32.mrb[3].mxu0  ;;  %v402_v4 = vmax.f32 %v346_v61, 0.0  ;;  %v2075_v61 = vld [vmem:[%s2374_s1 + $0x158] ss:$12 sps:$4 sm:$0xff]   ;;  %v2088_v0 = vld [vmem:[%s2374_s1 + $0x170] ss:$12 sps:$4 sm:$0xff]  }
  0xf3   : > { %v341_v3 = vadd.f32 %v340_v2, %v1991_v59  ;;  %v400_v6 = vmax.f32 %v338_v63, 0.0  ;;  %v1710_v63 = vld [vmem:[%s2374_s1 + $0x1c8] ss:$12 sps:$4 sm:$0xff]   ;;  %v2103_v2 = vld [vmem:[%s2374_s1 + $0x1a0] ss:$12 sps:$4 sm:$0xff]  }
  0xf4   : > { %v403_v5 = vmax.f32 %v349_v1, 0.0  ;;  %v2096_v1 = vld [vmem:[%s2374_s1 + $0x188] ss:$12 sps:$4 sm:$0xff]  }
  0xf5   : > { %v401_v7 = vmax.f32 %v341_v3, 0.0  ;;  %v2110_v3 = vld [vmem:[%s2374_s1 + $0x1b8] ss:$12 sps:$4 sm:$0xff]  }
  0xf6   : > { %v417_v8 = vpack.c.bf16 %v403_v5, %v402_v4  ;;  %v2117_v4 = vld [vmem:[%s2374_s1 + $0x1d0] ss:$12 sps:$4 sm:$0xff]   ;;  %v425_v5 = vlaneseq }
  0xf7   : > { %v416_v10 = vpack.c.bf16 %v401_v7, %v400_v6  ;;  %v1572_v11 = vpop.f32.mrb[4].mxu0 }
  0xf8   : > { %v362_v12 = vadd.f32 %v1572_v11, %v1991_v59  ;;  %v353_v13 = vpop.f32.mrb[5].mxu0  ;;  %v2120_v6 = vshrl.u32 %v425_v5, 7 }
  0xf9   : > { %1423 = vmatmul.mubr.msk.bf16.vlgmr.msra.gmra.mrb[0].mxu1 %vm495_vm1, %v416_v10  ;;  %v354_v14 = vadd.f32 %v353_v13, %v1991_v59  ;;  %v1573_v15 = vpop.f32.mrb[6].mxu0 }
  0xfa   : > { %v406_v16 = vmax.f32 %v362_v12, 0.0  ;;  %v365_v17 = vadd.f32 %v1573_v15, %v1991_v59  ;;  %v356_v18 = vpop.f32.mrb[7].mxu0  ;;  %562 = vmatprep.mubr.bf16.mxu1 %v1782_v38  ;;  %1594 = vmatpush1.bf16.msra.mxu1 %v2000_v9  ;;  %v427_v7 = vsub.s32 0, %v2120_v6  ;;  %v431_v10 = vsub.s32 1, %v2120_v6 }
  0xfb   : > { %v404_v20 = vmax.f32 %v354_v14, 0.0  ;;  %v357_v21 = vadd.f32 %v356_v18, %v1991_v59  ;;  %1583 = vmatprep.subr.bf16.mxu1 %v1782_v38 }
  0xfc   : > { %v407_v22 = vmax.f32 %v365_v17, 0.0 }
  0xfd   : > { %v405_v23 = vmax.f32 %v357_v21, 0.0 }
  0xfe   : > { %v419_v24 = vpack.c.bf16 %v407_v22, %v406_v16  ;;  %1595 = vmatpush1.bf16.msra.mxu1 %v2011_v19 }
  0xff   : > { %v418_v26 = vpack.c.bf16 %v405_v23, %v404_v20  ;;  %v1576_v27 = vpop.f32.mrb[8].mxu0  ;;  %1584 = vmatprep.subr.bf16.mxu1 %v1782_v38 }
 0x100   : > { %v378_v28 = vadd.f32 %v1576_v27, %v1991_v59  ;;  %v369_v29 = vpop.f32.mrb[9].mxu0 }
 0x101   : > { %1424 = vmatmul.mubr.msk.bf16.gmra.mrb[4].mxu1 %vm495_vm1, %v417_v8  ;;  %v370_v30 = vadd.f32 %v369_v29, %v1991_v59  ;;  %v1577_v31 = vpop.f32.mrb[10].mxu0  ;;  %v1399_v8 = vld [vmem:[%s2375_s2 + $0x18] ss:$8 sm:$0x3] }
 0x102   : > { %572 = vmatprep.mubr.bf16.mxu1 %v1782_v38  ;;  %v410_v32 = vmax.f32 %v378_v28, 0.0  ;;  %v381_v33 = vadd.f32 %v1577_v31, %v1991_v59  ;;  %v372_v34 = vpop.f32.mrb[11].mxu0  ;;  %1596 = vmatpush1.bf16.msra.mxu1 %v2019_v25  ;;  %v2129_v11 = vrot.slane %v1399_v8, %v427_v7  ;;  %v2133_v12 = vrot.slane %v1399_v8, %v431_v10 }
 0x103   : > { %v408_v36 = vmax.f32 %v370_v30, 0.0  ;;  %v373_v37 = vadd.f32 %v372_v34, %v1991_v59  ;;  %1585 = vmatprep.subr.bf16.mxu1 %v1782_v38 }
 0x104   : > { %v411_v39 = vmax.f32 %v381_v33, 0.0 }
 0x105   : > { %v409_v40 = vmax.f32 %v373_v37, 0.0 }
 0x106   : > { %v421_v41 = vpack.c.bf16 %v411_v39, %v410_v32  ;;  %1597 = vmatpush1.bf16.msra.mxu1 %v2031_v35 }
 0x107   : > { %v420_v43 = vpack.c.bf16 %v409_v40, %v408_v36  ;;  %v1580_v44 = vpop.f32.mrb[12].mxu0  ;;  %1586 = vmatprep.subr.bf16.mxu1 %v1782_v38 }
 0x108   : > { %v394_v45 = vadd.f32 %v1580_v44, %v1991_v59  ;;  %v385_v46 = vpop.f32.mrb[13].mxu0 }
 0x109   : > { %1425 = vmatmul.mubr.msk.bf16.gmra.mrb[8].mxu1 %vm495_vm1, %v418_v26  ;;  %v386_v47 = vadd.f32 %v385_v46, %v1991_v59  ;;  %v1581_v48 = vpop.f32.mrb[14].mxu0 }
 0x10a   : > { %582 = vmatprep.mubr.bf16.mxu1 %v1782_v38  ;;  %v414_v49 = vmax.f32 %v394_v45, 0.0  ;;  %v397_v50 = vadd.f32 %v1581_v48, %v1991_v59  ;;  %v388_v51 = vpop.f32.mrb[15].mxu0  ;;  %1598 = vmatpush1.bf16.msra.mxu1 %v2039_v42 }
 0x10b   : > { %v412_v52 = vmax.f32 %v386_v47, 0.0  ;;  %v389_v53 = vadd.f32 %v388_v51, %v1991_v59  ;;  %1587 = vmatprep.subr.bf16.mxu1 %v1782_v38  ;;  %v1708_v59 = vld [vmem:[%s2374_s1 + $0x1b4] ss:$12 sps:$4 sm:$0xff]  }
 0x10c   : > { %v415_v54 = vmax.f32 %v397_v50, 0.0  ;;  %934 = vmatprep.subr.bf16.mxu0 %v1708_v59 }
 0x10d   : > { %v413_v55 = vmax.f32 %v389_v53, 0.0  ;;  %935 = vmatpush1.bf16.msra.mxu0 %v1706_v60 }
 0x10e   : > { %v423_v56 = vpack.c.bf16 %v415_v54, %v414_v49  ;;  %1599 = vmatpush1.bf16.msra.mxu1 %v2062_v58  ;;  %936 = vmatprep.subr.bf16.mxu0 %v1712_v62 }
 0x10f   : > { %v422_v57 = vpack.c.bf16 %v413_v55, %v412_v52  ;;  %1588 = vmatprep.subr.bf16.mxu1 %v1782_v38 }
 0x111   : > { %1426 = vmatmul.mubr.msk.bf16.gmra.mrb[12].mxu1 %vm495_vm1, %v419_v24  ;;  %937 = vmatpush1.bf16.msra.mxu0 %v1710_v63 }
 0x112   : > { %592 = vmatprep.mubr.bf16.mxu1 %v1782_v38  ;;  %1600 = vmatpush1.bf16.msra.mxu1 %v2075_v61 }
 0x113   : > { %1589 = vmatprep.subr.bf16.mxu1 %v1782_v38  ;;  %1027 = vmatprep.subr.bf16.mxu0 %v1782_v38 }
 0x116   : > { %1601 = vmatpush1.bf16.msra.mxu1 %v2088_v0 }
 0x117   : > { %1590 = vmatprep.subr.bf16.mxu1 %v1782_v38 }
 0x119   : > { %1427 = vmatmul.mubr.msk.bf16.gmra.mrb[16].mxu1 %vm495_vm1, %v420_v43 }
 0x11a   : > { %602 = vmatprep.mubr.bf16.mxu1 %v1782_v38  ;;  %1602 = vmatpush1.bf16.msra.mxu1 %v2096_v1 }
 0x11b   : > { %1591 = vmatprep.subr.bf16.mxu1 %v1782_v38 }
 0x11e   : > { %1603 = vmatpush1.bf16.msra.mxu1 %v2103_v2 }
 0x11f   : > { %1592 = vmatprep.subr.bf16.mxu1 %v1782_v38 }
 0x121   : > { %1428 = vmatmul.mubr.msk.bf16.gmra.mrb[20].mxu1 %vm495_vm1, %v421_v41 }
 0x122   : > { %612 = vmatprep.mubr.bf16.mxu1 %v1782_v38  ;;  %1604 = vmatpush1.bf16.msra.mxu1 %v2110_v3 }
 0x123   : > { %1593 = vmatprep.subr.bf16.mxu1 %v1782_v38 }
 0x126   : > { %1605 = vmatpush1.bf16.msra.mxu1 %v2117_v4 }
 0x129   : > { %1429 = vmatmul.mubr.msk.bf16.gmra.mrb[24].mxu1 %vm495_vm1, %v422_v57 }
 0x12a   : > { %622 = vmatprep.mubr.bf16.mxu1 %v1782_v38 }
 0x131   : > { %1430 = vmatmul.mubr.msk.bf16.gmra.mrb[28].mxu1 %vm495_vm1, %v423_v56 }
 0x1cc   : > { %v554_v13 = vpop.f32.mrb[0].mxu1 }
 0x1cd   : > { %v555_v14 = vadd.f32 %v554_v13, %v2129_v11  ;;  %v556_v15 = vpop.f32.mrb[1].mxu1 }
 0x1ce   : > { %v557_v16 = vadd.f32 %v556_v15, %v2133_v12  ;;  %v558_v17 = vpop.f32.mrb[2].mxu1 }
 0x1cf   : > { %v559_v18 = vadd.f32 %v558_v17, %v2129_v11  ;;  %v560_v20 = vpop.f32.mrb[3].mxu1  ;;  %v633_v22 = vmax.f32 %v555_v14, 0.0 }
 0x1d0   : > { %v561_v21 = vadd.f32 %v560_v20, %v2133_v12  ;;  %v634_v24 = vmax.f32 %v557_v16, 0.0 }
 0x1d1   : > { %v635_v23 = vmax.f32 %v559_v18, 0.0 }
 0x1d2   : > { %v636_v26 = vmax.f32 %v561_v21, 0.0 }
 0x1d3   : > { %v2139_v27 = vpack.c.bf16 %v635_v23, %v633_v22 }
 0x1d4   : > { %v2141_v28 = vpack.c.bf16 %v636_v26, %v634_v24  ;;  %v564_v29 = vpop.f32.mrb[4].mxu1 }
 0x1d5   : > { %v565_v30 = vadd.f32 %v564_v29, %v2129_v11  ;;  %v566_v31 = vpop.f32.mrb[5].mxu1 }
 0x1d6   : > { %v567_v32 = vadd.f32 %v566_v31, %v2133_v12  ;;  %v568_v33 = vpop.f32.mrb[6].mxu1  ;;  %1467 = vmatprep.mubr.msk.bf16.mxu0 %vm889_vm2, %v2141_v28 }
 0x1d7   : > { %v569_v34 = vadd.f32 %v568_v33, %v2129_v11  ;;  %v570_v36 = vpop.f32.mrb[7].mxu1  ;;  %947 = vmatmul.mubr.bf16.vlgmr.msra.gmra.mrb[16].mxu0 %v2139_v27  ;;  %v637_v39 = vmax.f32 %v565_v30, 0.0 }
 0x1d8   : > { %v571_v37 = vadd.f32 %v570_v36, %v2133_v12  ;;  %1028 = vmatpush1.bf16.msra.mxu0 %v2000_v9  ;;  %v638_v41 = vmax.f32 %v567_v32, 0.0 }
 0x1d9   : > { %v639_v40 = vmax.f32 %v569_v34, 0.0  ;;  %1029 = vmatprep.subr.bf16.mxu0 %v1782_v38 }
 0x1da   : > { %v640_v43 = vmax.f32 %v571_v37, 0.0 }
 0x1db   : > { %v2152_v44 = vpack.c.bf16 %v639_v40, %v637_v39 }
 0x1dc   : > { %v2154_v45 = vpack.c.bf16 %v640_v43, %v638_v41  ;;  %v574_v46 = vpop.f32.mrb[8].mxu1  ;;  %1030 = vmatpush1.bf16.msra.mxu0 %v2011_v19 }
 0x1dd   : > { %v575_v47 = vadd.f32 %v574_v46, %v2129_v11  ;;  %v576_v48 = vpop.f32.mrb[9].mxu1  ;;  %1031 = vmatprep.subr.bf16.mxu0 %v1782_v38 }
 0x1de   : > { %v577_v9 = vadd.f32 %v576_v48, %v2133_v12  ;;  %v578_v49 = vpop.f32.mrb[10].mxu1  ;;  %1468 = vmatprep.mubr.msk.bf16.mxu0 %vm889_vm2, %v2154_v45 }
 0x1df   : > { %v579_v50 = vadd.f32 %v578_v49, %v2129_v11  ;;  %v580_v51 = vpop.f32.mrb[11].mxu1  ;;  %957 = vmatmul.mubr.bf16.gmra.mrb[20].mxu0 %v2152_v44  ;;  %v641_v19 = vmax.f32 %v575_v47, 0.0 }
 0x1e0   : > { %v581_v52 = vadd.f32 %v580_v51, %v2133_v12  ;;  %1032 = vmatpush1.bf16.msra.mxu0 %v2019_v25  ;;  %v642_v54 = vmax.f32 %v577_v9, 0.0 }
 0x1e1   : > { %v643_v53 = vmax.f32 %v579_v50, 0.0  ;;  %1033 = vmatprep.subr.bf16.mxu0 %v1782_v38 }
 0x1e2   : > { %v644_v55 = vmax.f32 %v581_v52, 0.0 }
 0x1e3   : > { %v669_v56 = vpack.c.bf16 %v643_v53, %v641_v19 }
 0x1e4   : > { %v670_v57 = vpack.c.bf16 %v644_v55, %v642_v54  ;;  %v584_v59 = vpop.f32.mrb[12].mxu1  ;;  %1034 = vmatpush1.bf16.msra.mxu0 %v2031_v35 }
 0x1e5   : > { %v585_v60 = vadd.f32 %v584_v59, %v2129_v11  ;;  %v586_v62 = vpop.f32.mrb[13].mxu1  ;;  %1035 = vmatprep.subr.bf16.mxu0 %v1782_v38 }
 0x1e6   : > { %v587_v63 = vadd.f32 %v586_v62, %v2133_v12  ;;  %v588_v5 = vpop.f32.mrb[14].mxu1  ;;  %1469 = vmatprep.mubr.msk.bf16.mxu0 %vm889_vm2, %v670_v57  ;;  %1477 = vmatprep.mubr.msk.bf16.mxu1 %vm889_vm2, %v670_v57 }
 0x1e7   : > { %v589_v25 = vadd.f32 %v588_v5, %v2129_v11  ;;  %v590_v8 = vpop.f32.mrb[15].mxu1  ;;  %967 = vmatmul.mubr.bf16.gmra.mrb[24].mxu0 %v669_v56  ;;  %1076 = vmatmul.mubr.bf16.vlgmr.msra.gmra.mrb[32].mxu1 %v669_v56  ;;  %v645_v35 = vmax.f32 %v585_v60, 0.0 }
 0x1e8   : > { %v591_v13 = vadd.f32 %v590_v8, %v2133_v12  ;;  %1036 = vmatpush1.bf16.msra.mxu0 %v2039_v42  ;;  %v646_v15 = vmax.f32 %v587_v63, 0.0 }
 0x1e9   : > { %v647_v14 = vmax.f32 %v589_v25, 0.0  ;;  %1037 = vmatprep.subr.bf16.mxu0 %v1782_v38 }
 0x1ea   : > { %v648_v16 = vmax.f32 %v591_v13, 0.0 }
 0x1eb   : > { %v671_v17 = vpack.c.bf16 %v647_v14, %v645_v35 }
 0x1ec   : > { %v672_v18 = vpack.c.bf16 %v648_v16, %v646_v15  ;;  %v594_v20 = vpop.f32.mrb[16].mxu1  ;;  %1038 = vmatpush1.bf16.msra.mxu0 %v2062_v58 }
 0x1ed   : > { %v595_v21 = vadd.f32 %v594_v20, %v2129_v11  ;;  %v596_v22 = vpop.f32.mrb[17].mxu1  ;;  %1039 = vmatprep.subr.bf16.mxu0 %v1782_v38 }
 0x1ee   : > { %v597_v23 = vadd.f32 %v596_v22, %v2133_v12  ;;  %v598_v24 = vpop.f32.mrb[18].mxu1  ;;  %1470 = vmatprep.mubr.msk.bf16.mxu0 %vm889_vm2, %v672_v18  ;;  %1478 = vmatprep.mubr.msk.bf16.mxu1 %vm889_vm2, %v672_v18 }
 0x1ef   : > { %v599_v42 = vadd.f32 %v598_v24, %v2129_v11  ;;  %v600_v26 = vpop.f32.mrb[19].mxu1  ;;  %977 = vmatmul.mubr.bf16.gmra.mrb[28].mxu0 %v671_v17  ;;  %1084 = vmatmul.mubr.bf16.gmra.mrb[36].mxu1 %v671_v17  ;;  %v649_v58 = vmax.f32 %v595_v21, 0.0 }
 0x1f0   : > { %v601_v29 = vadd.f32 %v600_v26, %v2133_v12  ;;  %1040 = vmatpush1.bf16.msra.mxu0 %v2075_v61  ;;  %v650_v31 = vmax.f32 %v597_v23, 0.0 }
 0x1f1   : > { %v651_v30 = vmax.f32 %v599_v42, 0.0  ;;  %1041 = vmatprep.subr.bf16.mxu0 %v1782_v38 }
 0x1f2   : > { %v652_v32 = vmax.f32 %v601_v29, 0.0 }
 0x1f3   : > { %v673_v33 = vpack.c.bf16 %v651_v30, %v649_v58  ;;  %v692_v30 = vsub.s32 2, %v2120_v6 }
 0x1f4   : > { %v674_v34 = vpack.c.bf16 %v652_v32, %v650_v31  ;;  %v604_v36 = vpop.f32.mrb[20].mxu1  ;;  %1042 = vmatpush1.bf16.msra.mxu0 %v2088_v0 }
 0x1f5   : > { %v605_v37 = vadd.f32 %v604_v36, %v2129_v11  ;;  %v606_v39 = vpop.f32.mrb[21].mxu1  ;;  %1043 = vmatprep.subr.bf16.mxu0 %v1782_v38 }
 0x1f6   : > { %v607_v40 = vadd.f32 %v606_v39, %v2133_v12  ;;  %v608_v41 = vpop.f32.mrb[22].mxu1  ;;  %1471 = vmatprep.mubr.msk.bf16.mxu0 %vm889_vm2, %v674_v34  ;;  %1479 = vmatprep.mubr.msk.bf16.mxu1 %vm889_vm2, %v674_v34 }
 0x1f7   : > { %v609_v61 = vadd.f32 %v608_v41, %v2129_v11  ;;  %v610_v43 = vpop.f32.mrb[23].mxu1  ;;  %987 = vmatmul.mubr.bf16.gmra.mrb[32].mxu0 %v673_v33  ;;  %1092 = vmatmul.mubr.bf16.gmra.mrb[40].mxu1 %v673_v33  ;;  %v653_v0 = vmax.f32 %v605_v37, 0.0 }
 0x1f8   : > { %v611_v46 = vadd.f32 %v610_v43, %v2133_v12  ;;  %1044 = vmatpush1.bf16.msra.mxu0 %v2096_v1  ;;  %v654_v48 = vmax.f32 %v607_v40, 0.0 }
 0x1f9   : > { %v655_v47 = vmax.f32 %v609_v61, 0.0  ;;  %1045 = vmatprep.subr.bf16.mxu0 %v1782_v38 }
 0x1fa   : > { %v656_v9 = vmax.f32 %v611_v46, 0.0 }
 0x1fb   : > { %v675_v49 = vpack.c.bf16 %v655_v47, %v653_v0 }
 0x1fc   : > { %v676_v50 = vpack.c.bf16 %v656_v9, %v654_v48  ;;  %v614_v51 = vpop.f32.mrb[24].mxu1  ;;  %1046 = vmatpush1.bf16.msra.mxu0 %v2103_v2 }
 0x1fd   : > { %v615_v52 = vadd.f32 %v614_v51, %v2129_v11  ;;  %v616_v19 = vpop.f32.mrb[25].mxu1  ;;  %1047 = vmatprep.subr.bf16.mxu0 %v1782_v38 }
 0x1fe   : > { %v617_v53 = vadd.f32 %v616_v19, %v2133_v12  ;;  %v618_v54 = vpop.f32.mrb[26].mxu1  ;;  %1472 = vmatprep.mubr.msk.bf16.mxu0 %vm889_vm2, %v676_v50  ;;  %1480 = vmatprep.mubr.msk.bf16.mxu1 %vm889_vm2, %v676_v50 }
 0x1ff   : > { %v619_v1 = vadd.f32 %v618_v54, %v2129_v11  ;;  %v620_v55 = vpop.f32.mrb[27].mxu1  ;;  %997 = vmatmul.mubr.bf16.gmra.mrb[36].mxu0 %v675_v49  ;;  %1100 = vmatmul.mubr.bf16.gmra.mrb[44].mxu1 %v675_v49  ;;  %v657_v2 = vmax.f32 %v615_v52, 0.0 }
 0x200   : > { %v621_v56 = vadd.f32 %v620_v55, %v2133_v12  ;;  %1048 = vmatpush1.bf16.msra.mxu0 %v2110_v3  ;;  %v658_v59 = vmax.f32 %v617_v53, 0.0 }
 0x201   : > { %v659_v57 = vmax.f32 %v619_v1, 0.0  ;;  %1049 = vmatprep.subr.bf16.mxu0 %v1782_v38 }
 0x202   : > { %v660_v60 = vmax.f32 %v621_v56, 0.0 }
 0x203   : > { %v677_v62 = vpack.c.bf16 %v659_v57, %v657_v2 }
 0x204   : > { %v678_v63 = vpack.c.bf16 %v660_v60, %v658_v59  ;;  %v624_v5 = vpop.f32.mrb[28].mxu1  ;;  %1050 = vmatpush1.bf16.msra.mxu0 %v2117_v4 }
 0x205   : > { %v625_v25 = vadd.f32 %v624_v5, %v2129_v11  ;;  %v626_v8 = vpop.f32.mrb[29].mxu1 }
 0x206   : > { %v627_v13 = vadd.f32 %v626_v8, %v2133_v12  ;;  %v628_v35 = vpop.f32.mrb[30].mxu1  ;;  %1473 = vmatprep.mubr.msk.bf16.mxu0 %vm889_vm2, %v678_v63  ;;  %1481 = vmatprep.mubr.msk.bf16.mxu1 %vm889_vm2, %v678_v63 }
 0x207   : > { %v629_v3 = vadd.f32 %v628_v35, %v2129_v11  ;;  %v630_v38 = vpop.f32.mrb[31].mxu1  ;;  %1007 = vmatmul.mubr.bf16.gmra.mrb[40].mxu0 %v677_v62  ;;  %1108 = vmatmul.mubr.bf16.gmra.mrb[48].mxu1 %v677_v62  ;;  %v661_v15 = vmax.f32 %v625_v25, 0.0  ;;  %v1400_v11 = vld [vmem:[%s2375_s2 + $0x30] ss:$8 sm:$0x7] }
 0x208   : > { %v631_v14 = vadd.f32 %v630_v38, %v2133_v12  ;;  %v662_v16 = vmax.f32 %v627_v13, 0.0  ;;  %v2228_v12 = vrot.slane %v1400_v11, %v427_v7  ;;  %v2232_v21 = vrot.slane %v1400_v11, %v431_v10 }
 0x209   : > { %v663_v4 = vmax.f32 %v629_v3, 0.0  ;;  %v2249_v39 = vrot.slane %v1400_v11, %v692_v30 }
 0x20a   : > { %v664_v17 = vmax.f32 %v631_v14, 0.0 }
 0x20b   : > { %v679_v18 = vpack.c.bf16 %v663_v4, %v661_v15 }
 0x20c   : > { %v680_v20 = vpack.c.bf16 %v664_v17, %v662_v16 }
 0x20e   : > { %1474 = vmatprep.mubr.msk.bf16.mxu0 %vm889_vm2, %v680_v20  ;;  %1482 = vmatprep.mubr.msk.bf16.mxu1 %vm889_vm2, %v680_v20 }
 0x20f   : > { %1017 = vmatmul.mubr.bf16.gmra.mrb[44].mxu0 %v679_v18  ;;  %1116 = vmatmul.mubr.bf16.gmra.mrb[52].mxu1 %v679_v18 }
 0x210   : > { %1475 = vmatprep.mubr.msk.bf16.mxu0 %vm889_vm2, %v2141_v28 }
 0x217   : > { %1060 = vmatmul.mubr.bf16.vlgmr.msra.gmra.mrb[48].mxu0 %v2139_v27 }
 0x218   : > { %1476 = vmatprep.mubr.msk.bf16.mxu0 %vm889_vm2, %v2154_v45 }
 0x21f   : > { %1068 = vmatmul.mubr.bf16.gmra.mrb[52].mxu0 %v2152_v44 }
 0x2aa   : > { %v948_v27 = vpop.f32.mrb[16].mxu0 }
 0x2ab   : > { %v949_v28 = vadd.f32 %v948_v27, %v2228_v12  ;;  %v950_v45 = vpop.f32.mrb[17].mxu0 }
 0x2ac   : > { %v951_v44 = vadd.f32 %v950_v45, %v2232_v21  ;;  %v952_v22 = vpop.f32.mrb[18].mxu0 }
 0x2ad   : > { %v953_v23 = vadd.f32 %v952_v22, %v2228_v12  ;;  %v954_v24 = vpop.f32.mrb[19].mxu0 }
 0x2ae   : > { %v1520_v42 = vpack.c.bf16 %v951_v44, %v949_v28  ;;  %v955_v7 = vadd.f32 %v954_v24, %v2232_v21 }
 0x2b0   : > { %1284 = vst [vmem:[%s2240_s28] sm:$0xff] %v1520_v42  ;;  %v1522_v10 = vpack.c.bf16 %v955_v7, %v953_v23 }
 0x2b2   : > { %1286 = vst [vmem:[%s2240_s28 + $0xc] sm:$0xff] %v1522_v10  ;;  %v958_v26 = vpop.f32.mrb[20].mxu0 }
 0x2b3   : > { %v959_v29 = vadd.f32 %v958_v26, %v2228_v12  ;;  %v960_v58 = vpop.f32.mrb[21].mxu0 }
 0x2b4   : > { %v961_v31 = vadd.f32 %v960_v58, %v2232_v21  ;;  %v962_v32 = vpop.f32.mrb[22].mxu0 }
 0x2b5   : > { %v963_v33 = vadd.f32 %v962_v32, %v2228_v12  ;;  %v964_v34 = vpop.f32.mrb[23].mxu0 }
 0x2b6   : > { %v1524_v36 = vpack.c.bf16 %v961_v31, %v959_v29  ;;  %v965_v37 = vadd.f32 %v964_v34, %v2232_v21 }
 0x2b8   : > { %1288 = vst [vmem:[%s2240_s28 + $0x18] sm:$0xff] %v1524_v36  ;;  %v1526_v40 = vpack.c.bf16 %v965_v37, %v963_v33 }
 0x2ba   : > { %1290 = vst [vmem:[%s2240_s28 + $0x24] sm:$0xff] %v1526_v40  ;;  %v968_v41 = vpop.f32.mrb[24].mxu0  ;;  %v1077_v61 = vpop.f32.mrb[32].mxu1 }
 0x2bb   : > { %v969_v43 = vadd.f32 %v968_v41, %v2228_v12  ;;  %v1078_v6 = vadd.f32 %v1077_v61, %v2249_v39  ;;  %v970_v46 = vpop.f32.mrb[25].mxu0  ;;  %v1079_v0 = vpop.f32.mrb[33].mxu1 }
 0x2bc   : > { %v971_v47 = vadd.f32 %v970_v46, %v2232_v21  ;;  %v972_v48 = vpop.f32.mrb[26].mxu0  ;;  %v1080_v9 = vpop.f32.mrb[34].mxu1 }
 0x2bd   : > { %v1529_v49 = vpack.c.bf16 %v1078_v6, %v1078_v6  ;;  %v973_v50 = vadd.f32 %v972_v48, %v2228_v12  ;;  %v1081_v51 = vadd.f32 %v1080_v9, %v2249_v39  ;;  %v974_v52 = vpop.f32.mrb[27].mxu0  ;;  %v1082_v19 = vpop.f32.mrb[35].mxu1 }
 0x2be   : > { %v1528_v53 = vpack.c.bf16 %v971_v47, %v969_v43  ;;  %v975_v54 = vadd.f32 %v974_v52, %v2232_v21 }
 0x2bf   : > { %1293 = vst [vmem:[%s2240_s28 + $0x38] sm:$0xf] %v1529_v49  ;;  %v1531_v1 = vpack.c.bf16 %v1081_v51, %v1081_v51 }
 0x2c0   : > { %1292 = vst [vmem:[%s2240_s28 + $0x30] sm:$0xff] %v1528_v53  ;;  %v1530_v55 = vpack.c.bf16 %v975_v54, %v973_v50 }
 0x2c1   : > { %1295 = vst [vmem:[%s2240_s28 + $0x44] sm:$0xf] %v1531_v1 }
 0x2c2   : > { %1294 = vst [vmem:[%s2240_s28 + $0x3c] sm:$0xff] %v1530_v55  ;;  %v978_v56 = vpop.f32.mrb[28].mxu0  ;;  %v1085_v2 = vpop.f32.mrb[36].mxu1 }
 0x2c3   : > { %v979_v57 = vadd.f32 %v978_v56, %v2228_v12  ;;  %v1086_v59 = vadd.f32 %v1085_v2, %v2249_v39  ;;  %v980_v60 = vpop.f32.mrb[29].mxu0  ;;  %v1087_v62 = vpop.f32.mrb[37].mxu1 }
 0x2c4   : > { %v981_v63 = vadd.f32 %v980_v60, %v2232_v21  ;;  %v982_v5 = vpop.f32.mrb[30].mxu0  ;;  %v1088_v25 = vpop.f32.mrb[38].mxu1 }
 0x2c5   : > { %v1533_v8 = vpack.c.bf16 %v1086_v59, %v1086_v59  ;;  %v983_v13 = vadd.f32 %v982_v5, %v2228_v12  ;;  %v1089_v35 = vadd.f32 %v1088_v25, %v2249_v39  ;;  %v984_v3 = vpop.f32.mrb[31].mxu0  ;;  %v1090_v38 = vpop.f32.mrb[39].mxu1 }
 0x2c6   : > { %v1532_v14 = vpack.c.bf16 %v981_v63, %v979_v57  ;;  %v985_v15 = vadd.f32 %v984_v3, %v2232_v21 }
 0x2c7   : > { %1297 = vst [vmem:[%s2240_s28 + $0x50] sm:$0xf] %v1533_v8  ;;  %v1535_v4 = vpack.c.bf16 %v1089_v35, %v1089_v35 }
 0x2c8   : > { %1296 = vst [vmem:[%s2240_s28 + $0x48] sm:$0xff] %v1532_v14  ;;  %v1534_v16 = vpack.c.bf16 %v985_v15, %v983_v13 }
 0x2c9   : > { %1299 = vst [vmem:[%s2240_s28 + $0x5c] sm:$0xf] %v1535_v4 }
 0x2ca   : > { %1298 = vst [vmem:[%s2240_s28 + $0x54] sm:$0xff] %v1534_v16  ;;  %v988_v17 = vpop.f32.mrb[32].mxu0  ;;  %v1093_v18 = vpop.f32.mrb[40].mxu1 }
 0x2cb   : > { %v989_v20 = vadd.f32 %v988_v17, %v2228_v12  ;;  %v1094_v11 = vadd.f32 %v1093_v18, %v2249_v39  ;;  %v990_v27 = vpop.f32.mrb[33].mxu0  ;;  %v1095_v28 = vpop.f32.mrb[41].mxu1 }
 0x2cc   : > { %v991_v45 = vadd.f32 %v990_v27, %v2232_v21  ;;  %v992_v44 = vpop.f32.mrb[34].mxu0  ;;  %v1096_v22 = vpop.f32.mrb[42].mxu1 }
 0x2cd   : > { %v1537_v23 = vpack.c.bf16 %v1094_v11, %v1094_v11  ;;  %v993_v24 = vadd.f32 %v992_v44, %v2228_v12  ;;  %v1097_v42 = vadd.f32 %v1096_v22, %v2249_v39  ;;  %v994_v7 = vpop.f32.mrb[35].mxu0  ;;  %v1098_v10 = vpop.f32.mrb[43].mxu1 }
 0x2ce   : > { %v1536_v26 = vpack.c.bf16 %v991_v45, %v989_v20  ;;  %v995_v29 = vadd.f32 %v994_v7, %v2232_v21 }
 0x2cf   : > { %1301 = vst [vmem:[%s2240_s28 + $0x68] sm:$0xf] %v1537_v23  ;;  %v1539_v58 = vpack.c.bf16 %v1097_v42, %v1097_v42 }
 0x2d0   : > { %1300 = vst [vmem:[%s2240_s28 + $0x60] sm:$0xff] %v1536_v26  ;;  %v1538_v30 = vpack.c.bf16 %v995_v29, %v993_v24 }
 0x2d1   : > { %1303 = vst [vmem:[%s2240_s28 + $0x74] sm:$0xf] %v1539_v58 }
 0x2d2   : > { %1302 = vst [vmem:[%s2240_s28 + $0x6c] sm:$0xff] %v1538_v30  ;;  %v998_v31 = vpop.f32.mrb[36].mxu0  ;;  %v1101_v32 = vpop.f32.mrb[44].mxu1 }
 0x2d3   : > { %v999_v33 = vadd.f32 %v998_v31, %v2228_v12  ;;  %v1102_v34 = vadd.f32 %v1101_v32, %v2249_v39  ;;  %v1000_v36 = vpop.f32.mrb[37].mxu0  ;;  %v1103_v37 = vpop.f32.mrb[45].mxu1 }
 0x2d4   : > { %v1001_v40 = vadd.f32 %v1000_v36, %v2232_v21  ;;  %v1002_v41 = vpop.f32.mrb[38].mxu0  ;;  %v1104_v61 = vpop.f32.mrb[46].mxu1 }
 0x2d5   : > { %v1541_v43 = vpack.c.bf16 %v1102_v34, %v1102_v34  ;;  %v1003_v6 = vadd.f32 %v1002_v41, %v2228_v12  ;;  %v1105_v46 = vadd.f32 %v1104_v61, %v2249_v39  ;;  %v1004_v0 = vpop.f32.mrb[39].mxu0  ;;  %v1106_v47 = vpop.f32.mrb[47].mxu1 }
 0x2d6   : > { %v1540_v48 = vpack.c.bf16 %v1001_v40, %v999_v33  ;;  %v1005_v9 = vadd.f32 %v1004_v0, %v2232_v21 }
 0x2d7   : > { %1305 = vst [vmem:[%s2240_s28 + $0x80] sm:$0xf] %v1541_v43  ;;  %v1543_v49 = vpack.c.bf16 %v1105_v46, %v1105_v46 }
 0x2d8   : > { %1304 = vst [vmem:[%s2240_s28 + $0x78] sm:$0xff] %v1540_v48  ;;  %v1542_v50 = vpack.c.bf16 %v1005_v9, %v1003_v6 }
 0x2d9   : > { %1307 = vst [vmem:[%s2240_s28 + $0x8c] sm:$0xf] %v1543_v49 }
 0x2da   : > { %1306 = vst [vmem:[%s2240_s28 + $0x84] sm:$0xff] %v1542_v50  ;;  %v1008_v51 = vpop.f32.mrb[40].mxu0  ;;  %v1109_v52 = vpop.f32.mrb[48].mxu1 }
 0x2db   : > { %v1009_v19 = vadd.f32 %v1008_v51, %v2228_v12  ;;  %v1110_v53 = vadd.f32 %v1109_v52, %v2249_v39  ;;  %v1010_v54 = vpop.f32.mrb[41].mxu0  ;;  %v1111_v1 = vpop.f32.mrb[49].mxu1 }
 0x2dc   : > { %v1011_v55 = vadd.f32 %v1010_v54, %v2232_v21  ;;  %v1012_v56 = vpop.f32.mrb[42].mxu0  ;;  %v1112_v2 = vpop.f32.mrb[50].mxu1 }
 0x2dd   : > { %v1545_v57 = vpack.c.bf16 %v1110_v53, %v1110_v53  ;;  %v1013_v59 = vadd.f32 %v1012_v56, %v2228_v12  ;;  %v1113_v60 = vadd.f32 %v1112_v2, %v2249_v39  ;;  %v1014_v62 = vpop.f32.mrb[43].mxu0  ;;  %v1114_v63 = vpop.f32.mrb[51].mxu1 }
 0x2de   : > { %v1544_v5 = vpack.c.bf16 %v1011_v55, %v1009_v19  ;;  %v1015_v25 = vadd.f32 %v1014_v62, %v2232_v21 }
 0x2df   : > { %1309 = vst [vmem:[%s2240_s28 + $0x98] sm:$0xf] %v1545_v57  ;;  %v1547_v8 = vpack.c.bf16 %v1113_v60, %v1113_v60 }
 0x2e0   : > { %1308 = vst [vmem:[%s2240_s28 + $0x90] sm:$0xff] %v1544_v5  ;;  %v1546_v13 = vpack.c.bf16 %v1015_v25, %v1013_v59 }
 0x2e1   : > { %1311 = vst [vmem:[%s2240_s28 + $0xa4] sm:$0xf] %v1547_v8 }
 0x2e2   : > { %1310 = vst [vmem:[%s2240_s28 + $0x9c] sm:$0xff] %v1546_v13  ;;  %v1018_v35 = vpop.f32.mrb[44].mxu0  ;;  %v1117_v3 = vpop.f32.mrb[52].mxu1 }
 0x2e3   : > { %v1019_v38 = vadd.f32 %v1018_v35, %v2228_v12  ;;  %v1118_v14 = vadd.f32 %v1117_v3, %v2249_v39  ;;  %v1020_v15 = vpop.f32.mrb[45].mxu0  ;;  %v1119_v4 = vpop.f32.mrb[53].mxu1 }
 0x2e4   : > { %v1021_v16 = vadd.f32 %v1020_v15, %v2232_v21  ;;  %v1022_v17 = vpop.f32.mrb[46].mxu0  ;;  %v1120_v18 = vpop.f32.mrb[54].mxu1 }
 0x2e5   : > { %v1549_v20 = vpack.c.bf16 %v1118_v14, %v1118_v14  ;;  %v1023_v11 = vadd.f32 %v1022_v17, %v2228_v12  ;;  %v1121_v27 = vadd.f32 %v1120_v18, %v2249_v39  ;;  %v1024_v28 = vpop.f32.mrb[47].mxu0  ;;  %v1122_v45 = vpop.f32.mrb[55].mxu1 }
 0x2e6   : > { %v1548_v44 = vpack.c.bf16 %v1021_v16, %v1019_v38  ;;  %v1025_v22 = vadd.f32 %v1024_v28, %v2232_v21 }
 0x2e7   : > { %1313 = vst [vmem:[%s2240_s28 + $0xb0] sm:$0xf] %v1549_v20  ;;  %v1551_v23 = vpack.c.bf16 %v1121_v27, %v1121_v27 }
 0x2e8   : > { %1312 = vst [vmem:[%s2240_s28 + $0xa8] sm:$0xff] %v1548_v44  ;;  %v1550_v24 = vpack.c.bf16 %v1025_v22, %v1023_v11 }
 0x2e9   : > { %1315 = vst [vmem:[%s2240_s28 + $0xbc] sm:$0xf] %v1551_v23 }
 0x2ea   : > { %1314 = vst [vmem:[%s2240_s28 + $0xb4] sm:$0xff] %v1550_v24  ;;  %v1061_v42 = vpop.f32.mrb[48].mxu0 }
 0x2eb   : > { %v1062_v12 = vadd.f32 %v1061_v42, %v2249_v39  ;;  %v1063_v7 = vpop.f32.mrb[49].mxu0 }
 0x2ec   : > { %v1064_v10 = vpop.f32.mrb[50].mxu0 }
 0x2ed   : > { %v1521_v26 = vpack.c.bf16 %v1062_v12, %v1062_v12  ;;  %v1065_v29 = vadd.f32 %v1064_v10, %v2249_v39  ;;  %v1066_v58 = vpop.f32.mrb[51].mxu0 }
 0x2ef   : > { %1285 = vst [vmem:[%s2240_s28 + $0x8] sm:$0xf] %v1521_v26  ;;  %v1523_v21 = vpack.c.bf16 %v1065_v29, %v1065_v29 }
 0x2f1   : > { %1287 = vst [vmem:[%s2240_s28 + $0x14] sm:$0xf] %v1523_v21 }
 0x2f2   : > { %v1069_v30 = vpop.f32.mrb[52].mxu0 }
 0x2f3   : > { %v1070_v31 = vadd.f32 %v1069_v30, %v2249_v39  ;;  %v1071_v32 = vpop.f32.mrb[53].mxu0 }
 0x2f4   : > { %v1072_v33 = vpop.f32.mrb[54].mxu0 }
 0x2f5   : > { %v1525_v34 = vpack.c.bf16 %v1070_v31, %v1070_v31  ;;  %v1073_v36 = vadd.f32 %v1072_v33, %v2249_v39  ;;  %v1074_v37 = vpop.f32.mrb[55].mxu0 }
 0x2f7   : > { %1289 = vst [vmem:[%s2240_s28 + $0x20] sm:$0xf] %v1525_v34  ;;  %v1527_v40 = vpack.c.bf16 %v1073_v36, %v1073_v36 }
 0x2f9   : > { %1291 = vst [vmem:[%s2240_s28 + $0x2c] sm:$0xf] %v1527_v40 }
 0x2fa   : > { %1731 = shalt.err (!%p1728_p3)
}
 0x2fb   : > { %s1732_s17 = scalar_lea.hbm %s2324_s7, 3072  ;;  %s1736_s24 = scalar_lea.hbm %s2376_s3, 24576 }
 0x2fc   : > { %p1733_p4 = scmp.ne.s32.totalorder %s2324_s7, %s1732_s17  ;;  %p1737_p9 = scmp.lt.u32.totalorder %s2324_s7, %s2376_s3 }
 0x2fd   : > { %p1738_p10 = scmp.lt.u32.totalorder %s1736_s24, %s1732_s17  ;;  %p1740_p12 = scmp.lt.u32.totalorder %s1732_s17, %s2324_s7 }
 0x2fe   : > { %p1734_p7 = pnand %p1733_p4, %p1844_p5 }
 0x2ff   : > { %p1739_p11 = por %p1738_p10, %p1737_p9 }
 0x300   : > { %p1735_p8 = pneg %p1734_p7 }
 0x301   : > { %p1741_p13 = por %p1740_p12, %p1739_p11 }
 0x303   : > { %p1742_p0 = pnand %p1741_p13, %p1735_p8 }
 0x305   : > { %1745 = shalt.err (!%p1742_p0)
}
 0x306   : > { %s1784_s27 = smov 192   ;;  %s1785_s29 = smov 12  }
 0x307   : > { %1608 = dma.vmem_to_hbm [thread:$0]  (%p1844_p5), %s2326_s4, 3072, %s2324_s7, %s2332_s16, %s1784_s27, %s1784_s27, %s1785_s29  }
 0x308 PF: > { %p1614_p1 = scmp.ge.s32.totalorder %s1780_s15, 2  ;;  %s1346_s28 = sand.u32 1, %s1768_s12  }
 0x309   : > { %s1347_s30 = scalar_lea.sflag [#allocation3], %s1346_s28 }
 0x30a   : > { %p1611_p2 = pnand %p1614_p1, %p1848_p6 }
 0x30c   : > { %1763 = dma.done.wait (!%p1611_p2), %s1347_s30, 3072  }
 0x30d   : > { %1765 = vsyncadd (!%p1611_p2), %s1347_s30, 4294964224  ;;  %p13_p3 = scmp.ge.s32.totalorder %s1831_s18, 10   ;;  %s2379_s12 = smov %s1772_s13 }
 0x30e   : > { %s2380_s13 = smov %s1776_s14  ;;  %s2381_s14 = smov %s1842_s21 }
 0x30f   : > { %s2382_s15 = smov %s1831_s18  ;;  %15 = sbr.rel (!%p13_p3) target bundleno = 3 (0x3), region = 69 }
 0x316   :  { %1352 = vsyncpa [#allocation3], 1 }
 0x317   :  { %1354 = vsyncpa [#allocation3 + $0x1], 1 }

</bundles_post_ra>
